<compile_context>
chip_gen: v6e
topology: v6e:2x2x1
jax: 0.10.0
libtpu: 0.0.40
codegen_flags: <defaults>
</compile_context>

<pallas_src>
import jax
import jax.numpy as jnp
from jax.experimental import pallas as pl
from jax.experimental.pallas import tpu as pltpu


# ----------------------------------------------------------------------------
# Sizing helpers
# ----------------------------------------------------------------------------
def _round_up(a, m):
    return -(-a // m) * m


def _hw_config():
    """(target_block_bytes, vmem_limit_bytes), generation-aware & conservative."""
    try:
        cap = int(pltpu.get_tpu_info().vmem_capacity_bytes)
    except Exception:
        cap = 64 << 20          # unknown chip: assume the smallest (v7x-like)
    if cap >= (100 << 20):      # v5e / v6e: 128 MiB physical VMEM
        return 4 << 20, 80 << 20
    return 2 << 20, 44 << 20    # v7x (64 MiB VMEM) or unknown


def _batch_tiling(N, C, T_pad, target_block_bytes):
    """Pick (Nb, N_pad, grid): batch items per grid step, padded batch, steps.

    Constraints:
      * if grid > 1, both the (Nb*C, T_pad) input block and the (Nb, T_pad)
        output block need sublane rows % 8 == 0;
      * keep the double-buffered input block plus a handful of (Nb*C, T_pad)
        temporaries inside the chosen VMEM budget;
      * emit >= 2 grid steps when the batch allows it so v7x's two TensorCores
        both get work (harmless on single-TC v5e/v6e).
    """
    row_bytes = T_pad * 4
    nb_cap = max(1, target_block_bytes // (C * row_bytes))
    if N < 8 and N <= nb_cap:
        # Tiny batch: one full-array block (grid==1 lifts the %8 block rule).
        # TODO(synk): padding N up to 16 would feed v7x's 2nd TensorCore, but
        # at N < 8 the padding waste outweighs the split.
        return N, N, 1
    if N <= nb_cap:
        steps = 4 if N >= 32 else 2
        nb = _round_up(pl.cdiv(N, steps), 8)
    else:
        nb = max(8, (min(N, nb_cap) // 8) * 8)
    grid = pl.cdiv(N, nb)
    return nb, grid * nb, grid


# ----------------------------------------------------------------------------
# Kernel
# ----------------------------------------------------------------------------
def _make_addstcn_kernel(num_levels, kernel_size, dilation_c, C, Nb, T, T_pad,
                         level_col_off, cw_col, cb_col):
    L, K = num_levels, kernel_size
    R = Nb * C  # rows per block, channel-major: row = c*Nb + n_local

    def kernel(x_ref, p_ref, o_ref):
        # x_ref : (R, T_pad)   input rows (row = c*Nb + n_local), lane-dense T
        # p_ref : (R, P)       packed per-row parameters (single DMA)
        # o_ref : (Nb, T_pad)  one output row per batch item of this block
        att = p_ref[:, 0:1]                       # sigmoid precomputed in wrapper
        h = x_ref[...] * att                      # feature-selection attention

        # (1, T_pad) column-index row for the once-per-level pad re-zero
        # (hoisted; broadcast_in_dim is not CSE'd by JAX).
        need_pad_zero = (K > 1) and (L > 1)
        if need_pad_zero:
            col = jax.lax.broadcasted_iota(jnp.int32, (1, T_pad), 1)
            in_seq = col < T

        # TODO(synk): for deep nets (large num_levels*K) switch these unrolled
        # Python loops to lax.fori_loop(..., unroll=True) to bound live ranges.
        for l in range(L):
            dilation = dilation_c ** l
            off = level_col_off[l]
            w = p_ref[:, off:off + K]             # (R, K) depthwise taps
            b = p_ref[:, off + K:off + K + 1]     # (R, 1) conv bias

            # Causal dilated depthwise conv ("chomped"); the bias and the
            # zero-shift tap are folded into the accumulator init.  Roll
            # wrap-around is exact because T_pad - T >= (K-1)*max_dilation and
            # h's pad columns are zero, so no per-tap causal mask is needed.
            conv = b + w[:, K - 1:K] * h
            for k in range(K - 1):
                shift = (K - 1 - k) * dilation
                conv = conv + w[:, k:k + 1] * pltpu.roll(h, shift, axis=1)

            is_first, is_last = (l == 0), (l == L - 1)
            if is_last and L > 1:
                # LastBlock: residual add; its Linear(C,C) is fused into cw/cb.
                h = conv + h
            elif is_first:
                # FirstBlock: per-channel PReLU, no residual.
                a = p_ref[:, off + K + 1:off + K + 2]
                h = jnp.where(conv >= 0, conv, a * conv)
            else:
                # TemporalBlock: per-channel PReLU over (conv + residual).
                a = p_ref[:, off + K + 1:off + K + 2]
                s = conv + h
                h = jnp.where(s >= 0, s, a * s)

            # Keep the right-pad time columns of h zero so the NEXT level's
            # roll wrap-around stays exact (not needed after the last level).
            if need_pad_zero and l < L - 1:
                h = jnp.where(in_seq, h, 0.0)

        # Fused [LastBlock Linear(C,C)] + [pointwise Conv1d(C,1,1)]:
        # per-row scale by the fused channel weight, then sum the C channel
        # slabs (rows are channel-major, so the slabs are contiguous slices).
        hw = h * p_ref[:, cw_col:cw_col + 1]      # (R, T_pad)
        acc = hw[0:Nb, :]
        for c in range(1, C):
            acc = acc + hw[c * Nb:(c + 1) * Nb, :]
        cb = p_ref[0:Nb, cb_col:cb_col + 1]       # fused scalar bias (replicated)
        o_ref[...] = (acc + cb).astype(o_ref.dtype)

    return kernel


# ----------------------------------------------------------------------------
# Wrapper
# ----------------------------------------------------------------------------
def addstcn_forward(x, att_logits, level_params, pw_w, pw_b,
                    *, kernel_size, dilation_c):
    """x: (N, C, T) float32.  Returns (N, T, 1), matching ADDSTCN.forward."""
    N, C, T = x.shape
    L = len(level_params)
    K = kernel_size
    f32 = jnp.float32

    # Time padding: enough zero right-padding that pltpu.roll wrap-around is
    # exact for the largest causal shift, then rounded up to lane-dense 128.
    max_shift = (K - 1) * (dilation_c ** (L - 1))
    T_pad = _round_up(T + max_shift, 128)
    # TODO(synk): for very long sequences add a time grid axis with a
    # (K-1)*max_dilation left halo instead of holding the full (rows, T_pad)
    # slab (bounds VMEM, esp. on v7x's 64 MiB).

    target_block_bytes, vmem_limit = _hw_config()
    Nb, N_pad, grid = _batch_tiling(N, C, T_pad, target_block_bytes)
    R = Nb * C

    # ---- one-time wrapper-side parameter preparation -----------------------
    att = jax.nn.sigmoid(att_logits.astype(f32))                     # (C, 1)

    # Fuse LastBlock's Linear(C,C) with the pointwise Conv1d(C,1,1):
    #   pw_w @ (lin_w @ z + lin_b) + pw_b
    #     == (pw_w @ lin_w) @ z + (pw_w @ lin_b + pw_b)     (exact)
    if L > 1:
        lin_w = level_params[-1][2].astype(f32)                      # (C, C)
        lin_b = level_params[-1][3].astype(f32)                      # (C, 1)
        cw = jnp.dot(pw_w.astype(f32), lin_w)                        # (1, C)
        cb = jnp.dot(pw_w.astype(f32), lin_b) + pw_b.astype(f32)     # (1, 1)
    else:  # single-level net: only the pointwise conv remains
        cw = pw_w.astype(f32)
        cb = pw_b.astype(f32)

    def per_row(p):  # (C, k) -> (R, k): rows are channel-major within a block
        return jnp.repeat(p.astype(f32), Nb, axis=0)

    # Pack every per-channel parameter into ONE (R, P) array -> single DMA.
    cols = [per_row(att)]                                            # col 0
    level_col_off = []
    off = 1
    for l, p in enumerate(level_params):
        level_col_off.append(off)
        cols.append(per_row(p[0]))                                   # taps (R, K)
        cols.append(per_row(p[1]))                                   # bias (R, 1)
        off += K + 1
        if not (l == L - 1 and L > 1):                               # PReLU slope
            cols.append(per_row(p[2]))
            off += 1
    cw_col = off
    cols.append(per_row(cw.reshape(C, 1)))                           # fused weight
    off += 1
    cb_col = off
    cols.append(jnp.broadcast_to(cb.reshape(1, 1), (R, 1)))          # fused bias
    params = jnp.concatenate(cols, axis=1)                           # (R, P)

    # ---- input layout: rows (block, channel, batch-in-block), lane-dense T -
    xp = jnp.pad(x.astype(f32), ((0, N_pad - N), (0, 0), (0, T_pad - T)))
    x2 = (xp.reshape(grid, Nb, C, T_pad)
            .transpose(0, 2, 1, 3)
            .reshape(N_pad * C, T_pad))
    # TODO(synk): for shallow (HBM-bound) nets, DMA x as bf16 and upcast after
    # the x_ref read to halve input HBM traffic (v5e/v6e win); kept f32 here
    # for exactness.

    kernel = _make_addstcn_kernel(L, K, dilation_c, C, Nb, T, T_pad,
                                  tuple(level_col_off), cw_col, cb_col)

    out = pl.pallas_call(
        kernel,
        out_shape=jax.ShapeDtypeStruct((N_pad, T_pad), f32),
        grid=(grid,),
        in_specs=[
            pl.BlockSpec((R, T_pad), lambda g: (g, 0)),      # per-step batch slab
            pl.BlockSpec(params.shape, lambda g: (0, 0)),    # packed params (const)
        ],
        out_specs=pl.BlockSpec((Nb, T_pad), lambda g: (g, 0)),
        compiler_params=pltpu.CompilerParams(
            dimension_semantics=("parallel",),
            vmem_limit_bytes=vmem_limit),
    )(x2, params)

    # (N_pad, T_pad) -> (N, T, 1)   (== y1.transpose(1, 2) in ADDSTCN.forward)
    return out[:N, :T][:, :, None]


# ----------------------------------------------------------------------------
# Pure-JAX reference (unfused, concatenate-based shifts) for correctness check
# ----------------------------------------------------------------------------
def _reference_forward(x, att_logits, level_params, pw_w, pw_b,
                       *, kernel_size, dilation_c):
    N, C, T = x.shape
    K = kernel_size
    L = len(level_params)
    hp = jax.lax.Precision.HIGHEST
    att = jax.nn.sigmoid(att_logits.astype(jnp.float32))            # (C, 1)
    h = x.astype(jnp.float32) * att[None]
    for l, p in enumerate(level_params):
        w, b = p[0], p[1]
        dilation = dilation_c ** l
        conv = jnp.zeros_like(h)
        for k in range(K):
            shift = (K - 1 - k) * dilation
            if shift == 0:
                sh = h
            elif shift >= T:
                sh = jnp.zeros_like(h)
            else:
                sh = jnp.concatenate(
                    [jnp.zeros((N, C, shift), jnp.float32), h[..., :T - shift]],
                    axis=-1)
            conv = conv + w[None, :, k:k + 1] * sh
        conv = conv + b[None]
        if l == 0 and L > 1:
            a = p[2]
            h = jnp.where(conv >= 0, conv, a[None] * conv)
        elif l == L - 1 and L > 1:
            lin_w, lin_b = p[2], p[3]
            z = conv + h
            h = jnp.einsum("oc,nct->not", lin_w, z, precision=hp) + lin_b[None]
        elif l == 0:                                   # single-level FirstBlock
            a = p[2]
            h = jnp.where(conv >= 0, conv, a[None] * conv)
        else:
            a = p[2]
            s = conv + h
            h = jnp.where(s >= 0, s, a[None] * s)
    y = jnp.einsum("oc,nct->not", pw_w, h, precision=hp) + pw_b[None]
    return jnp.transpose(y, (0, 2, 1))                               # (N, T, 1)


if __name__ == "__main__":
    # Small, module-consistent shapes: batch=2, input_size=4, seq_len=16,
    # num_levels=2, kernel_size=3, dilation_c=2.
    N, C, T = 2, 4, 16
    num_levels, K, dilation_c = 2, 3, 2

    key = jax.random.PRNGKey(0)
    ks = jax.random.split(key, 10)

    # fs_attention_logits = ones (as in ADDSTCN.__init__)
    att_logits = jnp.ones((C, 1), jnp.float32)

    # FirstBlock: depthwise conv weight ~ N(0, 0.1), bias, PReLU slope 0.25
    w0 = 0.1 * jax.random.normal(ks[0], (C, K), jnp.float32)
    b0 = 0.1 * jax.random.normal(ks[1], (C, 1), jnp.float32)
    a0 = jnp.full((C, 1), 0.25, jnp.float32)

    # LastBlock: depthwise conv weight/bias, Linear(C, C), bias
    w1 = 0.1 * jax.random.normal(ks[2], (C, K), jnp.float32)
    b1 = 0.1 * jax.random.normal(ks[3], (C, 1), jnp.float32)
    lin_w = 0.01 * jax.random.normal(ks[4], (C, C), jnp.float32)
    lin_b = 0.1 * jax.random.normal(ks[5], (C, 1), jnp.float32)

    level_params = [
        (w0, b0, a0),            # level 0: FirstBlock
        (w1, b1, lin_w, lin_b),  # level 1: LastBlock
    ]

    # pointwise Conv1d(C, 1, 1): weight ~ N(0, 0.1) per init_weights, plus bias
    pw_w = 0.1 * jax.random.normal(ks[6], (1, C), jnp.float32)
    pw_b = 0.1 * jax.random.normal(ks[7], (1, 1), jnp.float32)

    x = jax.random.normal(ks[8], (N, C, T), jnp.float32)

    y = addstcn_forward(x, att_logits, level_params, pw_w, pw_b,
                        kernel_size=K, dilation_c=dilation_c)
    y = jax.block_until_ready(y)
    assert y.shape == (N, T, 1), y.shape

    # Correctness vs. an independent unfused reference (roll wrap-around vs
    # concat shifts, fused vs two-step affine).  Tolerance covers rounding /
    # reassociation differences.
    y_ref = _reference_forward(x, att_logits, level_params, pw_w, pw_b,
                               kernel_size=K, dilation_c=dilation_c)
    err = float(jnp.max(jnp.abs(y - y_ref)))
    assert err < 5e-4, f"max |pallas - ref| = {err}"

    # TODO(synk): attention_regularization / get_sparsity_stats /
    # get_attention_scores are host-side diagnostics, not part of the forward
    # hot path; not ported to Pallas.
    print("KERNEL_OK")
</pallas_src>

<mosaic_0001>
module attributes {stable_mosaic.version = 11 : i64} {
  func.func @kernel(%arg0: i32, %arg1: memref<8x128xf32, #tpu.memory_space<vmem>>, %arg2: memref<8x12xf32, #tpu.memory_space<vmem>>, %arg3: memref<2x128xf32, #tpu.memory_space<vmem>>) attributes {dimension_semantics = [#tpu.dimension_semantics<parallel>], iteration_bounds = array<i64: 1>, scalar_prefetch = 0 : i64, scratch_operands = 0 : i64, tpu.core_type = #tpu.core_type<tc>, window_params = [{transform_indices = @transform_0, window_bounds = array<i64: 8, 128>}, {pipeline_mode = #tpu.pipeline_mode<synchronous>, transform_indices = @transform_1, window_bounds = array<i64: 8, 12>}, {transform_indices = @transform_2, window_bounds = array<i64: 2, 128>}]} {
    %c0 = arith.constant 0 : index
    %c0_0 = arith.constant 0 : index
    %0 = vector.load %arg2[%c0, %c0_0] : memref<8x12xf32, #tpu.memory_space<vmem>>, vector<8x1xf32>
    %c0_1 = arith.constant 0 : index
    %c0_2 = arith.constant 0 : index
    %1 = vector.load %arg1[%c0_1, %c0_2] : memref<8x128xf32, #tpu.memory_space<vmem>>, vector<8x128xf32>
    %2 = vector.broadcast %0 : vector<8x1xf32> to vector<8x128xf32>
    %3 = arith.mulf %1, %2 : vector<8x128xf32>
    %4 = tpu.iota {dimensions = array<i32: 1>} : vector<1x128xi32>
    %c16_i32 = arith.constant 16 : i32
    %5 = vector.broadcast %c16_i32 : i32 to vector<1x128xi32>
    %6 = arith.cmpi slt, %4, %5 : vector<1x128xi32>
    %c0_3 = arith.constant 0 : index
    %c1 = arith.constant 1 : index
    %7 = vector.load %arg2[%c0_3, %c1] : memref<8x12xf32, #tpu.memory_space<vmem>>, vector<8x3xf32>
    %c0_4 = arith.constant 0 : index
    %c4 = arith.constant 4 : index
    %8 = vector.load %arg2[%c0_4, %c4] : memref<8x12xf32, #tpu.memory_space<vmem>>, vector<8x1xf32>
    %9 = vector.extract_strided_slice %7 {offsets = [0, 2], sizes = [8, 1], strides = [1, 1]} : vector<8x3xf32> to vector<8x1xf32>
    %10 = vector.broadcast %9 : vector<8x1xf32> to vector<8x128xf32>
    %11 = arith.mulf %10, %3 : vector<8x128xf32>
    %12 = vector.broadcast %8 : vector<8x1xf32> to vector<8x128xf32>
    %13 = arith.addf %12, %11 : vector<8x128xf32>
    %14 = vector.extract_strided_slice %7 {offsets = [0, 0], sizes = [8, 1], strides = [1, 1]} : vector<8x3xf32> to vector<8x1xf32>
    %c2_i32 = arith.constant 2 : i32
    %15 = tpu.dynamic_rotate %3 by %c2_i32 dim 1 : vector<8x128xf32>, i32 -> vector<8x128xf32>
    %16 = vector.broadcast %14 : vector<8x1xf32> to vector<8x128xf32>
    %17 = arith.mulf %16, %15 : vector<8x128xf32>
    %18 = arith.addf %13, %17 : vector<8x128xf32>
    %19 = vector.extract_strided_slice %7 {offsets = [0, 1], sizes = [8, 1], strides = [1, 1]} : vector<8x3xf32> to vector<8x1xf32>
    %c1_i32 = arith.constant 1 : i32
    %20 = tpu.dynamic_rotate %3 by %c1_i32 dim 1 : vector<8x128xf32>, i32 -> vector<8x128xf32>
    %21 = vector.broadcast %19 : vector<8x1xf32> to vector<8x128xf32>
    %22 = arith.mulf %21, %20 : vector<8x128xf32>
    %23 = arith.addf %18, %22 : vector<8x128xf32>
    %c0_5 = arith.constant 0 : index
    %c5 = arith.constant 5 : index
    %24 = vector.load %arg2[%c0_5, %c5] : memref<8x12xf32, #tpu.memory_space<vmem>>, vector<8x1xf32>
    %cst = arith.constant 0.000000e+00 : f32
    %25 = vector.broadcast %cst : f32 to vector<8x128xf32>
    %26 = arith.cmpf oge, %23, %25 : vector<8x128xf32>
    %27 = vector.broadcast %24 : vector<8x1xf32> to vector<8x128xf32>
    %28 = arith.mulf %27, %23 : vector<8x128xf32>
    %29 = arith.select %26, %23, %28 : vector<8x128xi1>, vector<8x128xf32>
    %cst_6 = arith.constant 0.000000e+00 : f32
    %30 = vector.shape_cast %6 : vector<1x128xi1> to vector<1x128xi1>
    %31 = vector.broadcast %30 : vector<1x128xi1> to vector<8x128xi1>
    %32 = vector.broadcast %cst_6 : f32 to vector<8x128xf32>
    %33 = arith.select %31, %29, %32 : vector<8x128xi1>, vector<8x128xf32>
    %c0_7 = arith.constant 0 : index
    %c6 = arith.constant 6 : index
    %34 = vector.load %arg2[%c0_7, %c6] : memref<8x12xf32, #tpu.memory_space<vmem>>, vector<8x3xf32>
    %c0_8 = arith.constant 0 : index
    %c9 = arith.constant 9 : index
    %35 = vector.load %arg2[%c0_8, %c9] : memref<8x12xf32, #tpu.memory_space<vmem>>, vector<8x1xf32>
    %36 = vector.extract_strided_slice %34 {offsets = [0, 2], sizes = [8, 1], strides = [1, 1]} : vector<8x3xf32> to vector<8x1xf32>
    %37 = vector.broadcast %36 : vector<8x1xf32> to vector<8x128xf32>
    %38 = arith.mulf %37, %33 : vector<8x128xf32>
    %39 = vector.broadcast %35 : vector<8x1xf32> to vector<8x128xf32>
    %40 = arith.addf %39, %38 : vector<8x128xf32>
    %41 = vector.extract_strided_slice %34 {offsets = [0, 0], sizes = [8, 1], strides = [1, 1]} : vector<8x3xf32> to vector<8x1xf32>
    %c4_i32 = arith.constant 4 : i32
    %42 = tpu.dynamic_rotate %33 by %c4_i32 dim 1 : vector<8x128xf32>, i32 -> vector<8x128xf32>
    %43 = vector.broadcast %41 : vector<8x1xf32> to vector<8x128xf32>
    %44 = arith.mulf %43, %42 : vector<8x128xf32>
    %45 = arith.addf %40, %44 : vector<8x128xf32>
    %46 = vector.extract_strided_slice %34 {offsets = [0, 1], sizes = [8, 1], strides = [1, 1]} : vector<8x3xf32> to vector<8x1xf32>
    %c2_i32_9 = arith.constant 2 : i32
    %47 = tpu.dynamic_rotate %33 by %c2_i32_9 dim 1 : vector<8x128xf32>, i32 -> vector<8x128xf32>
    %48 = vector.broadcast %46 : vector<8x1xf32> to vector<8x128xf32>
    %49 = arith.mulf %48, %47 : vector<8x128xf32>
    %50 = arith.addf %45, %49 : vector<8x128xf32>
    %51 = arith.addf %50, %33 : vector<8x128xf32>
    %c0_10 = arith.constant 0 : index
    %c10 = arith.constant 10 : index
    %52 = vector.load %arg2[%c0_10, %c10] : memref<8x12xf32, #tpu.memory_space<vmem>>, vector<8x1xf32>
    %53 = vector.broadcast %52 : vector<8x1xf32> to vector<8x128xf32>
    %54 = arith.mulf %51, %53 : vector<8x128xf32>
    %55 = vector.extract_strided_slice %54 {offsets = [0, 0], sizes = [2, 128], strides = [1, 1]} : vector<8x128xf32> to vector<2x128xf32>
    %56 = vector.extract_strided_slice %54 {offsets = [2, 0], sizes = [2, 128], strides = [1, 1]} : vector<8x128xf32> to vector<2x128xf32>
    %57 = arith.addf %55, %56 : vector<2x128xf32>
    %58 = vector.extract_strided_slice %54 {offsets = [4, 0], sizes = [2, 128], strides = [1, 1]} : vector<8x128xf32> to vector<2x128xf32>
    %59 = arith.addf %57, %58 : vector<2x128xf32>
    %60 = vector.extract_strided_slice %54 {offsets = [6, 0], sizes = [2, 128], strides = [1, 1]} : vector<8x128xf32> to vector<2x128xf32>
    %61 = arith.addf %59, %60 : vector<2x128xf32>
    %c0_11 = arith.constant 0 : index
    %c11 = arith.constant 11 : index
    %62 = vector.load %arg2[%c0_11, %c11] : memref<8x12xf32, #tpu.memory_space<vmem>>, vector<2x1xf32>
    %63 = vector.broadcast %62 : vector<2x1xf32> to vector<2x128xf32>
    %64 = arith.addf %61, %63 : vector<2x128xf32>
    %c0_12 = arith.constant 0 : index
    %c0_13 = arith.constant 0 : index
    %65 = vector.load %arg3[%c0_12, %c0_13] : memref<2x128xf32, #tpu.memory_space<vmem>>, vector<2x128xf32>
    tpu.vector_store %arg3[%c0_12, %c0_13], %64 {strides = array<i32>} : memref<2x128xf32, #tpu.memory_space<vmem>>, vector<2x128xf32>,
    return
  }
  func.func @transform_0(%arg0: i32) -> (i32, i32) {
    %c0_i32 = arith.constant 0 : i32
    %c0_i32_0 = arith.constant 0 : i32
    return %arg0, %c0_i32 : i32, i32
  }
  func.func @transform_1(%arg0: i32) -> (i32, i32) {
    %c0_i32 = arith.constant 0 : i32
    %c0_i32_0 = arith.constant 0 : i32
    %c0_i32_1 = arith.constant 0 : i32
    return %c0_i32, %c0_i32_0 : i32, i32
  }
  func.func @transform_2(%arg0: i32) -> (i32, i32) {
    %c0_i32 = arith.constant 0 : i32
    %c0_i32_0 = arith.constant 0 : i32
    return %arg0, %c0_i32 : i32, i32
  }
}

</mosaic_0001>

<bundles_post_ra>
// kernel: tpu_custom_call.1
= control target key start
LH: loop header
LB: loop body
LE: loop exit
PB: predicated region body
PF: predicated region fallthrough
CT: control target
= control target key end

     0   :  { %7 = vsyncpa [#allocation3], 0  ;;  %s288_s0 = inlined_call_operand.hbm [shape: f32[8,128], index: 0, kind: input, shape index: {}]   ;;  %s289_s1 = inlined_call_operand.hbm [shape: f32[8,12], index: 1, kind: input, shape index: {}]   ;;  %s290_s2 = inlined_call_operand.hbm [shape: f32[2,128], index: 2, kind: output, shape index: {}]  }
   0x1   :  { %8 = vsyncpa [#allocation6], 0 }
   0x2   :  { %9 = vsyncpa [#allocation4], 0  ;;  %s246_s9 = smov [#allocation2]   ;;  %s247_s11 = smov [#allocation5]  }
   0x3   :  { %s16_s10 = sshll.u32 %s246_s9, 4  ;;  %s26_s12 = sshll.u32 %s247_s11, 4  ;;  %s17_s10 = int_to_ptr.vmem [resolvable:$true] %s16_s10  ;;  %s27_s12 = int_to_ptr.vmem [resolvable:$true] %s26_s12 }
   0x4   :  { %s188_s13 = scalar_lea.vmem %s17_s10, 128  ;;  %p193_p1 = scmp.lt.s32.totalorder %s17_s10, %s17_s10 }
   0x5   :  { %p189_p0 = scmp.ne.s32.totalorder %s17_s10, %s188_s13  ;;  %p194_p2 = scmp.lt.s32.totalorder %s188_s13, %s188_s13 }
   0x7   :  { %p195_p3 = por %p194_p2, %p193_p1 }
   0x9   :  { %p196_p4 = pnand %p195_p3, %p189_p0 }
   0xb   :  { %199 = shalt.err (!%p196_p4)
}
   0xc   :  { %19 = dma.hbm_to_vmem [thread:$0]  %s288_s0, 128, %s17_s10, [#allocation3]  }
   0xd   :  { %s208_s16 = scalar_lea.vmem %s27_s12, 128  ;;  %p213_p6 = scmp.lt.s32.totalorder %s27_s12, %s27_s12 }
   0xe   :  { %p209_p5 = scmp.ne.s32.totalorder %s27_s12, %s208_s16  ;;  %p214_p7 = scmp.lt.s32.totalorder %s208_s16, %s208_s16 }
  0x10   :  { %p215_p8 = por %p214_p7, %p213_p6 }
  0x12   :  { %p216_p9 = pnand %p215_p8, %p209_p5 }
  0x14   :  { %219 = shalt.err (!%p216_p9)
}
  0x15   :  { %29 = dma.hbm_to_vmem [thread:$0]  %s289_s1, 128, %s27_s12, [#allocation6]  }
  0x16   :  { %240 = dma.done.wait [#allocation3], 128  }
  0x17   :  { %241 = vsyncadd [#allocation3], 4294967168 }
  0x18   :  { %242 = dma.done.wait [#allocation6], 128  }
  0x19   :  { %243 = vsyncadd [#allocation6], 4294967168  ;;  %v248_v0 = vmov 0   ;;  %v249_v1 = vmov 4   ;;  %v36_v2 = vld [vmem:[#allocation5] sm:$0xff]  ;;  %v250_v3 = vmov 3   ;;  %v44_v23 = vlaneseq }
  0x1a   :  { %167 = vset.pattern.permute.xlu0 %v248_v0  ;;  %169 = vset.pattern.permute.xlu1 %v249_v1  ;;  %v251_v4 = vmov 1   ;;  %v252_v5 = vmov 2   ;;  %v253_v6 = vmov 9   ;;  %v254_v7 = vmov 5   ;;  %v37_v11 = vld [vmem:[#allocation2] sm:$0xff]  ;;  %s258_s0 = smov 2  }
  0x1b   :  { %40 = vperm.xlu0 %167, %v36_v2   ;;  %53 = vperm.xlu1 %169, %v36_v2   ;;  %v255_v8 = vmov 8   ;;  %v256_v9 = vmov 6   ;;  %v257_v10 = vmov 7   ;;  %s259_s1 = smov 1   ;;  %v260_v14 = vmov 11   ;;  %s262_s19 = smov 4  }
  0x1c   :  { %v261_v15 = vmov 10   ;;  %v45_v28 = vand.u32 127, %v44_v23  ;;  %v125_v34 = vld [vmem:[#allocation5] sm:$0x3]  ;;  %s263_s20 = smov [#allocation7]  }
  0x1d   :  { %s139_s21 = sshll.u32 %s263_s20, 4  ;;  %s140_s21 = int_to_ptr.vmem [resolvable:$true] %s139_s21 }
  0x1e   :  { %vm46_vm1 = vcmp.lt.s32.totalorder %v45_v28, 16  ;;  %s220_s22 = scalar_lea.vmem %s140_s21, 32  ;;  %p225_p11 = scmp.lt.s32.totalorder %s140_s21, %s140_s21 }
  0x1f   :  { %168 = vset.pattern.permute.xlu0 %v250_v3  ;;  %170 = vset.pattern.permute.xlu1 %v251_v4  ;;  %p221_p10 = scmp.ne.s32.totalorder %s140_s21, %s220_s22  ;;  %p226_p12 = scmp.lt.s32.totalorder %s220_s22, %s220_s22 }
  0x20   :  { %48 = vperm.xlu0 %168, %v36_v2   ;;  %60 = vperm.xlu1 %170, %v36_v2  }
  0x21   :  { %p227_p13 = por %p226_p12, %p225_p11 }
  0x23   :  { %p228_p0 = pnand %p227_p13, %p221_p10 }
  0x24   :  { %171 = vset.pattern.permute.xlu1 %v252_v5  ;;  %174 = vset.pattern.permute.xlu0 %v253_v6 }
  0x25   :  { %68 = vperm.xlu1 %171, %v36_v2  }
  0x29   :  { %172 = vset.pattern.permute.xlu1 %v254_v7 }
  0x2a   :  { %75 = vperm.xlu1 %172, %v36_v2  }
  0x2e   :  { %173 = vset.pattern.permute.xlu1 %v255_v8 }
  0x2f   :  { %84 = vperm.xlu1 %173, %v36_v2  }
  0x33   :  { %175 = vset.pattern.permute.xlu1 %v256_v9 }
  0x34   :  { %96 = vperm.xlu1 %175, %v36_v2  }
  0x38   :  { %176 = vset.pattern.permute.xlu1 %v257_v10 }
  0x39   :  { %104 = vperm.xlu1 %176, %v36_v2  }
  0x3d   :  { %178 = vset.pattern.permute.xlu1 %v260_v14 }
  0x96   :  { %v41_v12 = vpop.permute.xlu0 %40  ;;  %v54_v16 = vpop.permute.xlu1 %53 }
  0x97   :  { %v43_v13 = vmul.f32 %v41_v12, %v37_v11 }
  0x99   :  { %57 = vrot.lane.b32.xlu0 %v43_v13, %s258_s0 }
  0x9b   :  { %v61_v17 = vpop.permute.xlu1 %60  ;;  %v49_v18 = vpop.permute.xlu0 %48 }
  0x9c   :  { %v51_v19 = vmul.f32 %v49_v18, %v43_v13 }
  0x9d   :  { %65 = vrot.lane.b32.xlu0 %v43_v13, %s259_s1 }
  0x9e   :  { %v56_v24 = vadd.f32 %v54_v16, %v51_v19 }
  0xa0   :  { %v69_v21 = vpop.permute.xlu1 %68 }
  0xa1   :  { %89 = vperm.xlu0 %174, %v36_v2  }
  0xa5   :  { %177 = vset.pattern.permute.xlu0 %v261_v15  ;;  %v76_v29 = vpop.permute.xlu1 %75 }
  0xaa   :  { %v85_v35 = vpop.permute.xlu1 %84 }
  0xaf   :  { %v97_v36 = vpop.permute.xlu1 %96 }
  0xb4   :  { %v105_v38 = vpop.permute.xlu1 %104 }
 0x10b   :  { %v58_v20 = vpop.permute.xlu0 %57 }
 0x10c   :  { %v63_v22 = vmul.f32 %v61_v17, %v58_v20 }
 0x10e   :  { %v64_v26 = vadd.f32 %v63_v22, %v56_v24 }
 0x10f   :  { %v66_v25 = vpop.permute.xlu0 %65 }
 0x110   :  { %v71_v27 = vmul.f32 %v69_v21, %v66_v25 }
 0x112   :  { %v72_v30 = vadd.f32 %v71_v27, %v64_v26 }
 0x114   :  { %vm73_vm0 = vcmp.ge.f32.partialorder %v72_v30, 0.0  ;;  %v78_v31 = vmul.f32 %v76_v29, %v72_v30 }
 0x116   :  { %v79_v32 = vsel %vm73_vm0, %v72_v30, %v78_v31 }
 0x117   :  { %v82_v33 = vsel %vm46_vm1, %v79_v32, 0.0 }
 0x118   :  { %101 = vrot.lane.b32.xlu1 %v82_v33, %s258_s0  ;;  %93 = vrot.lane.b32.xlu0 %v82_v33, %s262_s19  ;;  %v87_v39 = vmul.f32 %v85_v35, %v82_v33 }
 0x11c   :  { %111 = vperm.xlu0 %177, %v36_v2   ;;  %128 = vperm.xlu1 %178, %v125_v34   ;;  %v90_v37 = vpop.permute.xlu0 %89 }
 0x11d   :  { %v92_v42 = vadd.f32 %v90_v37, %v87_v39 }
 0x120   :  { %179 = vset.pattern.permute.xlu0 %v260_v14 }
 0x18a   :  { %v94_v40 = vpop.permute.xlu0 %93  ;;  %v102_v43 = vpop.permute.xlu1 %101 }
 0x18b   :  { %v99_v41 = vmul.f32 %v97_v36, %v94_v40  ;;  %v107_v45 = vmul.f32 %v105_v38, %v102_v43 }
 0x18d   :  { %v100_v44 = vadd.f32 %v99_v41, %v92_v42 }
 0x18f   :  { %v108_v46 = vadd.f32 %v107_v45, %v100_v44 }
 0x191   :  { %v109_v47 = vadd.f32 %v108_v46, %v82_v33 }
 0x197   :  { %v112_v48 = vpop.permute.xlu0 %111  ;;  %v129_v55 = vpop.permute.xlu1 %128 }
 0x198   :  { %v114_v49 = vmul.f32 %v112_v48, %v109_v47 }
 0x19a   :  { %v116_v50 = vrot.slane %v114_v49, 2  ;;  %v119_v52 = vrot.slane %v114_v49, 4  ;;  %v122_v54 = vrot.slane %v114_v49, 6 }
 0x19c   :  { %v118_v51 = vadd.f32 %v116_v50, %v114_v49 }
 0x19e   :  { %v121_v53 = vadd.f32 %v119_v52, %v118_v51 }
 0x1a0   :  { %v124_v56 = vadd.f32 %v122_v54, %v121_v53 }
 0x1a2   :  { %v131_v57 = vadd.f32 %v129_v55, %v124_v56 }
 0x1a4   :  { %132 = vst [vmem:[#allocation7] sm:$0x3] %v131_v57 }
 0x1a5   :  { %231 = shalt.err (!%p228_p0)
}
 0x1a6   :  { %142 = dma.vmem_to_hbm [thread:$0]  %s140_s21, 32, %s290_s2, [#allocation4]  }
 0x1a7   :  { %244 = dma.done.wait [#allocation4], 32  }
 0x1a8   :  { %245 = vsyncadd [#allocation4], 4294967264 }
 0x1a9   :  { %146 = vsyncpa [#allocation3], 1 }
 0x1aa   :  { %147 = vsyncpa [#allocation6], 1 }
 0x1ab   :  { %148 = vsyncpa [#allocation4], 1 }

</bundles_post_ra>
